<compile_context>
chip_gen: v6e
topology: v6e:2x2x1
jax: 0.10.0
libtpu: 0.0.40
codegen_flags: <defaults>
</compile_context>

<pallas_src>
import jax
import jax.numpy as jnp
from jax.experimental import pallas as pl
from jax.experimental.pallas import tpu as pltpu


def _round_up(n, m):
    return ((n + m - 1) // m) * m


def _mlp_kernel(x_ref, w1_ref, b1_ref, w2_ref, b2_ref,
                w3_ref, b3_ref, w4_ref, b4_ref, o_ref):
    # x arrives f32 from HBM; cast to the compute dtype on the VPU (free slot).
    x = x_ref[...].astype(w1_ref.dtype)
    # Four MXU matmuls (bf16 or f32 operands, f32 accumulation) fused with the
    # VPU bias-add / ReLU chain.  Weights are VMEM-resident across grid steps.
    h = jnp.dot(x, w1_ref[...], preferred_element_type=jnp.float32) + b1_ref[...]
    h = jnp.maximum(h, 0.0)
    h = jnp.dot(h.astype(w2_ref.dtype), w2_ref[...],
                preferred_element_type=jnp.float32) + b2_ref[...]
    h = jnp.maximum(h, 0.0)
    h = jnp.dot(h.astype(w3_ref.dtype), w3_ref[...],
                preferred_element_type=jnp.float32) + b3_ref[...]
    h = jnp.maximum(h, 0.0)
    out = jnp.dot(h.astype(w4_ref.dtype), w4_ref[...],
                  preferred_element_type=jnp.float32) + b4_ref[...]
    o_ref[...] = out.astype(o_ref.dtype)


def init_params(key, n_states, n_actions):
    """PyTorch-style nn.Linear init: U(-1/sqrt(fan_in), 1/sqrt(fan_in)), f32."""
    dims = [(n_states, 128), (128, 256), (256, 256), (256, n_actions)]
    params = {}
    for i, (fan_in, fan_out) in enumerate(dims, start=1):
        key, kw, kb = jax.random.split(key, 3)
        bound = 1.0 / jnp.sqrt(jnp.float32(fan_in))
        params[f"w{i}"] = jax.random.uniform(
            kw, (fan_in, fan_out), jnp.float32, -bound, bound)
        params[f"b{i}"] = jax.random.uniform(
            kb, (1, fan_out), jnp.float32, -bound, bound)
    return params


def prepare_params(params, compute_dtype=jnp.bfloat16):
    """One-time: cast weights to the compute dtype.  Biases stay f32 (f32
    bias-add / ReLU on the VPU).  No padding: layer-1 K stays at the true
    n_states and layer-4 N at the true n_actions (full-dim blocks are legal).
    """
    # TODO(synk): small-batch, weight-DMA-bound serving could narrow weights
    # further (int8 + per-channel scales on v5e/v6e, fp8-e4m3 on v7x).
    prepared = {f"w{i}": params[f"w{i}"].astype(compute_dtype) for i in range(1, 5)}
    prepared.update(
        {f"b{i}": params[f"b{i}"].astype(jnp.float32) for i in range(1, 5)})
    prepared["n_states"] = int(params["w1"].shape[0])
    prepared["n_actions"] = int(params["w4"].shape[1])
    return prepared


def _choose_tile_b(batch, requested=None):
    if requested is not None:
        return _round_up(requested, 8)
    b = max(batch, 1)
    if b <= 512:
        # Small batch: a single grid step (no per-step pipeline overhead).
        return _round_up(b, 8)
    # Large batch: big tiles amortize the ~0.35 us/step pipeline overhead, and
    # >= 2 grid steps let the "parallel" batch axis shard across both
    # TensorCores on v7x (the extra step is negligible on v5e/v6e).
    return min(2048, _round_up(pl.cdiv(b, 2), 128))


def pa_dqn_net_forward(x, prepared, *, tile_b=None, out_dtype=None):
    """x: (B, n_states) f32.  prepared: output of prepare_params().

    tile_b: optional batch-tile override (rounded up to a multiple of 8).
    out_dtype: output dtype; defaults to the compute dtype (bf16 fast path
    emits a bf16 output, halving the writeback; the f32 path stays exact).
    """
    # TODO(synk): if the consumer only needs max/argmax over actions, fuse that
    # reduction into the kernel and drop the (B, n_actions) writeback entirely.
    B, n_states = x.shape
    assert n_states == prepared["n_states"]
    n_actions = prepared["n_actions"]
    compute_dtype = prepared["w1"].dtype
    if out_dtype is None:
        out_dtype = compute_dtype

    tile_b = _choose_tile_b(B, tile_b)
    b_pad = _round_up(max(B, 1), tile_b)
    # Only a (cheap, often zero) batch pad; no feature pad and no dtype cast
    # on the host -- the cast happens inside the kernel.
    xp = x if b_pad == B else jnp.pad(x, ((0, b_pad - B), (0, 0)))

    grid = (b_pad // tile_b,)

    # Advisory cost estimate for the XLA scheduler.
    flops = 2 * b_pad * (n_states * 128 + 128 * 256 + 256 * 256 + 256 * n_actions)
    weight_bytes = sum(
        int(prepared[k].size) * prepared[k].dtype.itemsize
        for k in ("w1", "w2", "w3", "w4", "b1", "b2", "b3", "b4"))
    bytes_accessed = (weight_bytes
                      + b_pad * n_states * x.dtype.itemsize               # x in
                      + b_pad * n_actions * jnp.dtype(out_dtype).itemsize)  # out

    def full_spec(a):
        # Whole array as one block; constant index_map -> fetched once, stays
        # VMEM-resident across every batch tile.
        return pl.BlockSpec(a.shape, lambda i: (0, 0))

    out_padded = pl.pallas_call(
        _mlp_kernel,
        out_shape=jax.ShapeDtypeStruct((b_pad, n_actions), out_dtype),
        grid=grid,
        in_specs=[
            pl.BlockSpec((tile_b, n_states), lambda i: (i, 0)),    # x tile
            full_spec(prepared["w1"]), full_spec(prepared["b1"]),
            full_spec(prepared["w2"]), full_spec(prepared["b2"]),
            full_spec(prepared["w3"]), full_spec(prepared["b3"]),
            full_spec(prepared["w4"]), full_spec(prepared["b4"]),
        ],
        out_specs=pl.BlockSpec((tile_b, n_actions), lambda i: (i, 0)),
        compiler_params=pltpu.CompilerParams(
            dimension_semantics=("parallel",)),                    # v7x megacore
        cost_estimate=pl.CostEstimate(
            flops=flops, transcendentals=0, bytes_accessed=bytes_accessed),
    )(xp, prepared["w1"], prepared["b1"], prepared["w2"], prepared["b2"],
      prepared["w3"], prepared["b3"], prepared["w4"], prepared["b4"])

    return out_padded[:B, :]


def _reference(x, p):
    h = jnp.maximum(x @ p["w1"] + p["b1"], 0.0)
    h = jnp.maximum(h @ p["w2"] + p["b2"], 0.0)
    h = jnp.maximum(h @ p["w3"] + p["b3"], 0.0)
    return h @ p["w4"] + p["b4"]


if __name__ == "__main__":
    n_states, n_actions, batch = 16, 8, 2
    key = jax.random.PRNGKey(0)
    key, kx = jax.random.split(key)
    x = jax.random.normal(kx, (batch, n_states), jnp.float32)
    params = init_params(key, n_states, n_actions)
    ref = _reference(x, params)

    # Exact f32 compute path (bit-level semantics of the PyTorch module).
    prep_f32 = prepare_params(params, compute_dtype=jnp.float32)
    out_f32 = pa_dqn_net_forward(x, prep_f32)
    jax.block_until_ready(out_f32)
    assert out_f32.shape == (batch, n_actions)
    assert jnp.allclose(out_f32, ref, atol=1e-4, rtol=1e-4)

    # Fast mixed-precision path: bf16 weights + bf16 activations/output
    # (halved weight DMA + writeback, 2x MXU throughput on v6e/v7x).
    prep_bf16 = prepare_params(params, compute_dtype=jnp.bfloat16)
    out_bf16 = pa_dqn_net_forward(x, prep_bf16)
    jax.block_until_ready(out_bf16)
    assert out_bf16.shape == (batch, n_actions)
    assert jnp.allclose(out_bf16.astype(jnp.float32), ref, atol=5e-2, rtol=5e-2)

    print("KERNEL_OK")
</pallas_src>

<mosaic_0001>
module attributes {stable_mosaic.version = 11 : i64} {
  func.func @_mlp_kernel(%arg0: i32, %arg1: memref<8x16xf32, #tpu.memory_space<vmem>>, %arg2: memref<16x128xf32, #tpu.memory_space<vmem>>, %arg3: memref<1x128xf32, #tpu.memory_space<vmem>>, %arg4: memref<128x256xf32, #tpu.memory_space<vmem>>, %arg5: memref<1x256xf32, #tpu.memory_space<vmem>>, %arg6: memref<256x256xf32, #tpu.memory_space<vmem>>, %arg7: memref<1x256xf32, #tpu.memory_space<vmem>>, %arg8: memref<256x8xf32, #tpu.memory_space<vmem>>, %arg9: memref<1x8xf32, #tpu.memory_space<vmem>>, %arg10: memref<8x8xf32, #tpu.memory_space<vmem>>) attributes {dimension_semantics = [#tpu.dimension_semantics<parallel>], iteration_bounds = array<i64: 1>, scalar_prefetch = 0 : i64, scratch_operands = 0 : i64, tpu.core_type = #tpu.core_type<tc>, window_params = [{transform_indices = @transform_0, window_bounds = array<i64: 8, 16>}, {pipeline_mode = #tpu.pipeline_mode<synchronous>, transform_indices = @transform_1, window_bounds = array<i64: 16, 128>}, {pipeline_mode = #tpu.pipeline_mode<synchronous>, transform_indices = @transform_2, window_bounds = array<i64: 1, 128>}, {pipeline_mode = #tpu.pipeline_mode<synchronous>, transform_indices = @transform_3, window_bounds = array<i64: 128, 256>}, {pipeline_mode = #tpu.pipeline_mode<synchronous>, transform_indices = @transform_4, window_bounds = array<i64: 1, 256>}, {pipeline_mode = #tpu.pipeline_mode<synchronous>, transform_indices = @transform_5, window_bounds = array<i64: 256, 256>}, {pipeline_mode = #tpu.pipeline_mode<synchronous>, transform_indices = @transform_6, window_bounds = array<i64: 1, 256>}, {pipeline_mode = #tpu.pipeline_mode<synchronous>, transform_indices = @transform_7, window_bounds = array<i64: 256, 8>}, {pipeline_mode = #tpu.pipeline_mode<synchronous>, transform_indices = @transform_8, window_bounds = array<i64: 1, 8>}, {transform_indices = @transform_9, window_bounds = array<i64: 8, 8>}]} {
    %c0 = arith.constant 0 : index
    %c0_0 = arith.constant 0 : index
    %0 = vector.load %arg1[%c0, %c0_0] : memref<8x16xf32, #tpu.memory_space<vmem>>, vector<8x16xf32>
    %c0_1 = arith.constant 0 : index
    %c0_2 = arith.constant 0 : index
    %1 = vector.load %arg2[%c0_1, %c0_2] : memref<16x128xf32, #tpu.memory_space<vmem>>, vector<16x128xf32>
    %cst = arith.constant dense<0.000000e+00> : vector<8x128xf32>
    %2 = tpu.matmul %0, %1, %cst {dimension_numbers = #tpu.dot_dimension_numbers<[1], [0], [0], [1], [0, 0, 1, 1], [], []>} : vector<8x16xf32>, vector<16x128xf32>, vector<8x128xf32> -> vector<8x128xf32>
    %c0_3 = arith.constant 0 : index
    %c0_4 = arith.constant 0 : index
    %3 = vector.load %arg3[%c0_3, %c0_4] : memref<1x128xf32, #tpu.memory_space<vmem>>, vector<1x128xf32>
    %4 = vector.broadcast %3 : vector<1x128xf32> to vector<8x128xf32>
    %5 = arith.addf %2, %4 : vector<8x128xf32>
    %cst_5 = arith.constant 0.000000e+00 : f32
    %6 = vector.broadcast %cst_5 : f32 to vector<8x128xf32>
    %7 = arith.maximumf %5, %6 : vector<8x128xf32>
    %c0_6 = arith.constant 0 : index
    %c0_7 = arith.constant 0 : index
    %8 = vector.load %arg4[%c0_6, %c0_7] : memref<128x256xf32, #tpu.memory_space<vmem>>, vector<128x256xf32>
    %cst_8 = arith.constant dense<0.000000e+00> : vector<8x256xf32>
    %9 = tpu.matmul %7, %8, %cst_8 {dimension_numbers = #tpu.dot_dimension_numbers<[1], [0], [0], [1], [0, 0, 1, 1], [], []>} : vector<8x128xf32>, vector<128x256xf32>, vector<8x256xf32> -> vector<8x256xf32>
    %c0_9 = arith.constant 0 : index
    %c0_10 = arith.constant 0 : index
    %10 = vector.load %arg5[%c0_9, %c0_10] : memref<1x256xf32, #tpu.memory_space<vmem>>, vector<1x256xf32>
    %11 = vector.broadcast %10 : vector<1x256xf32> to vector<8x256xf32>
    %12 = arith.addf %9, %11 : vector<8x256xf32>
    %cst_11 = arith.constant 0.000000e+00 : f32
    %13 = vector.broadcast %cst_11 : f32 to vector<8x256xf32>
    %14 = arith.maximumf %12, %13 : vector<8x256xf32>
    %c0_12 = arith.constant 0 : index
    %c0_13 = arith.constant 0 : index
    %15 = vector.load %arg6[%c0_12, %c0_13] : memref<256x256xf32, #tpu.memory_space<vmem>>, vector<256x256xf32>
    %cst_14 = arith.constant dense<0.000000e+00> : vector<8x256xf32>
    %16 = tpu.matmul %14, %15, %cst_14 {dimension_numbers = #tpu.dot_dimension_numbers<[1], [0], [0], [1], [0, 0, 1, 1], [], []>} : vector<8x256xf32>, vector<256x256xf32>, vector<8x256xf32> -> vector<8x256xf32>
    %c0_15 = arith.constant 0 : index
    %c0_16 = arith.constant 0 : index
    %17 = vector.load %arg7[%c0_15, %c0_16] : memref<1x256xf32, #tpu.memory_space<vmem>>, vector<1x256xf32>
    %18 = vector.broadcast %17 : vector<1x256xf32> to vector<8x256xf32>
    %19 = arith.addf %16, %18 : vector<8x256xf32>
    %cst_17 = arith.constant 0.000000e+00 : f32
    %20 = vector.broadcast %cst_17 : f32 to vector<8x256xf32>
    %21 = arith.maximumf %19, %20 : vector<8x256xf32>
    %c0_18 = arith.constant 0 : index
    %c0_19 = arith.constant 0 : index
    %22 = vector.load %arg8[%c0_18, %c0_19] : memref<256x8xf32, #tpu.memory_space<vmem>>, vector<256x8xf32>
    %cst_20 = arith.constant dense<0.000000e+00> : vector<8x8xf32>
    %23 = tpu.matmul %21, %22, %cst_20 {dimension_numbers = #tpu.dot_dimension_numbers<[1], [0], [0], [1], [0, 0, 1, 1], [], []>} : vector<8x256xf32>, vector<256x8xf32>, vector<8x8xf32> -> vector<8x8xf32>
    %c0_21 = arith.constant 0 : index
    %c0_22 = arith.constant 0 : index
    %24 = vector.load %arg9[%c0_21, %c0_22] : memref<1x8xf32, #tpu.memory_space<vmem>>, vector<1x8xf32>
    %25 = vector.broadcast %24 : vector<1x8xf32> to vector<8x8xf32>
    %26 = arith.addf %23, %25 : vector<8x8xf32>
    %c0_23 = arith.constant 0 : index
    %c0_24 = arith.constant 0 : index
    %27 = vector.load %arg10[%c0_23, %c0_24] : memref<8x8xf32, #tpu.memory_space<vmem>>, vector<8x8xf32>
    tpu.vector_store %arg10[%c0_23, %c0_24], %26 {strides = array<i32>} : memref<8x8xf32, #tpu.memory_space<vmem>>, vector<8x8xf32>,
    return
  }
  func.func @transform_0(%arg0: i32) -> (i32, i32) {
    %c0_i32 = arith.constant 0 : i32
    %c0_i32_0 = arith.constant 0 : i32
    return %arg0, %c0_i32 : i32, i32
  }
  func.func @transform_1(%arg0: i32) -> (i32, i32) {
    %c0_i32 = arith.constant 0 : i32
    %c0_i32_0 = arith.constant 0 : i32
    %c0_i32_1 = arith.constant 0 : i32
    return %c0_i32, %c0_i32_0 : i32, i32
  }
  func.func @transform_2(%arg0: i32) -> (i32, i32) {
    %c0_i32 = arith.constant 0 : i32
    %c0_i32_0 = arith.constant 0 : i32
    %c0_i32_1 = arith.constant 0 : i32
    return %c0_i32, %c0_i32_0 : i32, i32
  }
  func.func @transform_3(%arg0: i32) -> (i32, i32) {
    %c0_i32 = arith.constant 0 : i32
    %c0_i32_0 = arith.constant 0 : i32
    %c0_i32_1 = arith.constant 0 : i32
    return %c0_i32, %c0_i32_0 : i32, i32
  }
  func.func @transform_4(%arg0: i32) -> (i32, i32) {
    %c0_i32 = arith.constant 0 : i32
    %c0_i32_0 = arith.constant 0 : i32
    %c0_i32_1 = arith.constant 0 : i32
    return %c0_i32, %c0_i32_0 : i32, i32
  }
  func.func @transform_5(%arg0: i32) -> (i32, i32) {
    %c0_i32 = arith.constant 0 : i32
    %c0_i32_0 = arith.constant 0 : i32
    %c0_i32_1 = arith.constant 0 : i32
    return %c0_i32, %c0_i32_0 : i32, i32
  }
  func.func @transform_6(%arg0: i32) -> (i32, i32) {
    %c0_i32 = arith.constant 0 : i32
    %c0_i32_0 = arith.constant 0 : i32
    %c0_i32_1 = arith.constant 0 : i32
    return %c0_i32, %c0_i32_0 : i32, i32
  }
  func.func @transform_7(%arg0: i32) -> (i32, i32) {
    %c0_i32 = arith.constant 0 : i32
    %c0_i32_0 = arith.constant 0 : i32
    %c0_i32_1 = arith.constant 0 : i32
    return %c0_i32, %c0_i32_0 : i32, i32
  }
  func.func @transform_8(%arg0: i32) -> (i32, i32) {
    %c0_i32 = arith.constant 0 : i32
    %c0_i32_0 = arith.constant 0 : i32
    %c0_i32_1 = arith.constant 0 : i32
    return %c0_i32, %c0_i32_0 : i32, i32
  }
  func.func @transform_9(%arg0: i32) -> (i32, i32) {
    %c0_i32 = arith.constant 0 : i32
    %c0_i32_0 = arith.constant 0 : i32
    return %arg0, %c0_i32 : i32, i32
  }
}

</mosaic_0001>

<bundles_post_ra>
// kernel: tpu_custom_call.1
= control target key start
LH: loop header
LB: loop body
LE: loop exit
PB: predicated region body
PF: predicated region fallthrough
CT: control target
= control target key end

     0   :  { %14 = vsyncpa [#allocation3], 0  ;;  %s934_s0 = inlined_call_operand.hbm [shape: f32[8,16], index: 0, kind: input, shape index: {}]   ;;  %s935_s1 = inlined_call_operand.vmem [shape: f32[16,128], index: 1, kind: input, shape index: {}]   ;;  %s936_s2 = inlined_call_operand.vmem [shape: f32[1,128], index: 2, kind: input, shape index: {}]   ;;  %s937_s3 = inlined_call_operand.vmem [shape: f32[128,256], index: 3, kind: input, shape index: {}]   ;;  %s938_s4 = inlined_call_operand.vmem [shape: f32[1,256], index: 4, kind: input, shape index: {}]   ;;  %s939_s5 = inlined_call_operand.hbm [shape: f32[256,256], index: 5, kind: input, shape index: {}]   ;;  %s940_s6 = inlined_call_operand.vmem [shape: f32[1,256], index: 6, kind: input, shape index: {}]   ;;  %s941_s7 = inlined_call_operand.vmem [shape: f32[256,8], index: 7, kind: input, shape index: {}]   ;;  %s942_s8 = inlined_call_operand.vmem [shape: f32[1,8], index: 8, kind: input, shape index: {}]   ;;  %s943_s9 = inlined_call_operand.hbm [shape: f32[8,8], index: 9, kind: output, shape index: {}]  }
   0x1   :  { %15 = vsyncpa [#allocation6], 0 }
   0x2   :  { %16 = vsyncpa [#allocation4], 0  ;;  %s658_s30 = smov [#allocation2]   ;;  %s659_s11 = smov [#allocation5]  }
   0x3   :  { %s23_s10 = sshll.u32 %s658_s30, 4  ;;  %s40_s12 = sshll.u32 %s659_s11, 4  ;;  %s24_s10 = int_to_ptr.vmem [resolvable:$true] %s23_s10  ;;  %s41_s12 = int_to_ptr.vmem [resolvable:$true] %s40_s12 }
   0x4   :  { %s600_s13 = scalar_lea.vmem %s24_s10, 128  ;;  %p605_p1 = scmp.lt.s32.totalorder %s24_s10, %s24_s10 }
   0x5   :  { %p601_p0 = scmp.ne.s32.totalorder %s24_s10, %s600_s13  ;;  %p606_p2 = scmp.lt.s32.totalorder %s600_s13, %s600_s13 }
   0x7   :  { %p607_p3 = por %p606_p2, %p605_p1 }
   0x9   :  { %p608_p4 = pnand %p607_p3, %p601_p0 }
   0xb   :  { %611 = shalt.err (!%p608_p4)
}
   0xc   :  { %26 = dma.hbm_to_vmem [thread:$0]  %s934_s0, 128, %s24_s10, [#allocation3]  }
   0xd   :  { %s620_s16 = scalar_lea.vmem %s41_s12, 8192  ;;  %p625_p6 = scmp.lt.s32.totalorder %s41_s12, %s41_s12 }
   0xe   :  { %p621_p5 = scmp.ne.s32.totalorder %s41_s12, %s620_s16  ;;  %p626_p7 = scmp.lt.s32.totalorder %s620_s16, %s620_s16 }
  0x10   :  { %p627_p8 = por %p626_p7, %p625_p6 }
  0x12   :  { %p628_p9 = pnand %p627_p8, %p621_p5 }
  0x14   :  { %631 = shalt.err (!%p628_p9)
}
  0x15   :  { %s660_s17 = smov 256   ;;  %s661_s18 = smov 16  }
  0x16   :  { %46 = dma.hbm_to_vmem [thread:$0]  %s939_s5, 8192, %s41_s12, [#allocation6], %s660_s17, %s660_s17, %s661_s18  }
  0x17   :  { %652 = dma.done.wait [#allocation3], 128  }
  0x18   :  { %653 = vsyncadd [#allocation3], 4294967168 }
  0x19   :  { %654 = dma.done.wait [#allocation6], 8192  }
  0x1a   :  { %655 = vsyncadd [#allocation6], 4294959104  ;;  %v662_v0 = vmov 0.0   ;;  %vm663_vm0 = vmmov 0   ;;  %v61_v1 = vld [vmem:[%s935_s1 + $0x8] sm:$0xff]  ;;  %v60_v2 = vld [vmem:[%s935_s1] sm:$0xff] }
  0x1b   :  { %578 = vmatprep.subr.mxu0 %v662_v0  ;;  %582 = vmatprep.mubr.msk.f32.mxu0 %vm663_vm0, %v662_v0  ;;  %v59_v3 = vld [vmem:[#allocation2] sm:$0xff]  ;;  %vm69_vm1 = vcmask 130048   ;;  %v175_v4 = vld [vmem:[%s937_s3 + $0xf8] sm:$0xff]  ;;  %v174_v5 = vld [vmem:[%s937_s3 + $0xf0] sm:$0xff]  ;;  %vm519_vm2 = vcmask 64512  }
  0x1c   :  { %252 = vmatprep.mubr.f32.mxu1 %v662_v0  ;;  %579 = vmatpush3.msra.mxu0 %v61_v1  ;;  %v173_v6 = vld [vmem:[%s937_s3 + $0xe8] sm:$0xff]  ;;  %v172_v7 = vld [vmem:[%s937_s3 + $0xe0] sm:$0xff]  ;;  %v171_v8 = vld [vmem:[%s937_s3 + $0xd8] sm:$0xff] }
  0x1d   :  { %580 = vmatprep.subr.mxu0 %v662_v0  ;;  %188 = vmatprep.subr.mxu1 %v175_v4  ;;  %v170_v9 = vld [vmem:[%s937_s3 + $0xd0] sm:$0xff]  ;;  %v169_v10 = vld [vmem:[%s937_s3 + $0xc8] sm:$0xff]  ;;  %v168_v11 = vld [vmem:[%s937_s3 + $0xc0] sm:$0xff] }
  0x1e   :  { %581 = vmatpush3.msra.mxu0 %v60_v2  ;;  %189 = vmatpush1.msra.mxu1 %v174_v5  ;;  %v167_v12 = vld [vmem:[%s937_s3 + $0xb8] sm:$0xff]  ;;  %v166_v13 = vld [vmem:[%s937_s3 + $0xb0] sm:$0xff]  ;;  %v165_v14 = vld [vmem:[%s937_s3 + $0xa8] sm:$0xff] }
  0x1f   :  { %583 = vmatmul.mubr.msk.f32.vlgmr.msra.gmra.mxu0 %vm69_vm1, %v59_v3  ;;  %190 = vmatprep.subr.mxu1 %v173_v6  ;;  %v164_v15 = vld [vmem:[%s937_s3 + $0xa0] sm:$0xff]  ;;  %v163_v16 = vld [vmem:[%s937_s3 + $0x98] sm:$0xff]  ;;  %v162_v17 = vld [vmem:[%s937_s3 + $0x90] sm:$0xff] }
  0x20   :  { %191 = vmatpush1.msra.mxu1 %v172_v7  ;;  %v161_v18 = vld [vmem:[%s937_s3 + $0x88] sm:$0xff]  ;;  %v160_v19 = vld [vmem:[%s937_s3 + $0x80] sm:$0xff]  ;;  %v159_v20 = vld [vmem:[%s937_s3 + $0x78] sm:$0xff] }
  0x21   :  { %192 = vmatprep.subr.mxu1 %v171_v8  ;;  %v158_v21 = vld [vmem:[%s937_s3 + $0x70] sm:$0xff]  ;;  %v157_v22 = vld [vmem:[%s937_s3 + $0x68] sm:$0xff]  ;;  %v156_v23 = vld [vmem:[%s937_s3 + $0x60] sm:$0xff] }
  0x22   :  { %193 = vmatpush1.msra.mxu1 %v170_v9  ;;  %v155_v24 = vld [vmem:[%s937_s3 + $0x58] sm:$0xff]  ;;  %v154_v25 = vld [vmem:[%s937_s3 + $0x50] sm:$0xff]  ;;  %v153_v26 = vld [vmem:[%s937_s3 + $0x48] sm:$0xff] }
  0x23   :  { %194 = vmatprep.subr.mxu1 %v169_v10  ;;  %v152_v27 = vld [vmem:[%s937_s3 + $0x40] sm:$0xff]  ;;  %v151_v28 = vld [vmem:[%s937_s3 + $0x38] sm:$0xff]  ;;  %v150_v29 = vld [vmem:[%s937_s3 + $0x30] sm:$0xff] }
  0x24   :  { %195 = vmatpush1.msra.mxu1 %v168_v11  ;;  %v149_v30 = vld [vmem:[%s937_s3 + $0x28] sm:$0xff]  ;;  %v148_v31 = vld [vmem:[%s937_s3 + $0x20] sm:$0xff]  ;;  %v147_v32 = vld [vmem:[%s937_s3 + $0x18] sm:$0xff] }
  0x25   :  { %196 = vmatprep.subr.mxu1 %v167_v12  ;;  %v146_v33 = vld [vmem:[%s937_s3 + $0x10] sm:$0xff]  ;;  %v145_v34 = vld [vmem:[%s937_s3 + $0x8] sm:$0xff]  ;;  %v144_v35 = vld [vmem:[%s937_s3] sm:$0xff] }
  0x26   :  { %197 = vmatpush1.msra.mxu1 %v166_v13  ;;  %v292_v36 = vld [vmem:[#allocation5 + $0xf8] sm:$0xff]  ;;  %v291_v37 = vld [vmem:[#allocation5 + $0xf0] sm:$0xff]  ;;  %v290_v38 = vld [vmem:[#allocation5 + $0xe8] sm:$0xff] }
  0x27   :  { %198 = vmatprep.subr.mxu1 %v165_v14  ;;  %337 = vmatprep.subr.mxu0 %v292_v36  ;;  %v289_v39 = vld [vmem:[#allocation5 + $0xe0] sm:$0xff]  ;;  %v288_v40 = vld [vmem:[#allocation5 + $0xd8] sm:$0xff]  ;;  %v287_v41 = vld [vmem:[#allocation5 + $0xd0] sm:$0xff] }
  0x28   :  { %199 = vmatpush1.msra.mxu1 %v164_v15  ;;  %338 = vmatpush1.msra.mxu0 %v291_v37  ;;  %v286_v42 = vld [vmem:[#allocation5 + $0xc8] sm:$0xff]  ;;  %v285_v43 = vld [vmem:[#allocation5 + $0xc0] sm:$0xff]  ;;  %v284_v44 = vld [vmem:[#allocation5 + $0xb8] sm:$0xff] }
  0x29   :  { %200 = vmatprep.subr.mxu1 %v163_v16  ;;  %339 = vmatprep.subr.mxu0 %v290_v38  ;;  %v283_v45 = vld [vmem:[#allocation5 + $0xb0] sm:$0xff]  ;;  %v282_v46 = vld [vmem:[#allocation5 + $0xa8] sm:$0xff]  ;;  %v281_v47 = vld [vmem:[#allocation5 + $0xa0] sm:$0xff] }
  0x2a   :  { %201 = vmatpush1.msra.mxu1 %v162_v17  ;;  %340 = vmatpush1.msra.mxu0 %v289_v39  ;;  %v280_v48 = vld [vmem:[#allocation5 + $0x98] sm:$0xff]  ;;  %v279_v49 = vld [vmem:[#allocation5 + $0x90] sm:$0xff]  ;;  %v278_v50 = vld [vmem:[#allocation5 + $0x88] sm:$0xff] }
  0x2b   :  { %202 = vmatprep.subr.mxu1 %v161_v18  ;;  %341 = vmatprep.subr.mxu0 %v288_v40  ;;  %v277_v51 = vld [vmem:[#allocation5 + $0x80] sm:$0xff]  ;;  %v276_v52 = vld [vmem:[#allocation5 + $0x78] sm:$0xff]  ;;  %v275_v53 = vld [vmem:[#allocation5 + $0x70] sm:$0xff] }
  0x2c   :  { %203 = vmatpush1.msra.mxu1 %v160_v19  ;;  %342 = vmatpush1.msra.mxu0 %v287_v41  ;;  %v274_v54 = vld [vmem:[#allocation5 + $0x68] sm:$0xff]  ;;  %v273_v55 = vld [vmem:[#allocation5 + $0x60] sm:$0xff]  ;;  %v272_v56 = vld [vmem:[#allocation5 + $0x58] sm:$0xff] }
  0x2d   :  { %204 = vmatprep.subr.mxu1 %v159_v20  ;;  %343 = vmatprep.subr.mxu0 %v286_v42  ;;  %v271_v57 = vld [vmem:[#allocation5 + $0x50] sm:$0xff]  ;;  %v270_v58 = vld [vmem:[#allocation5 + $0x48] sm:$0xff]  ;;  %v269_v59 = vld [vmem:[#allocation5 + $0x40] sm:$0xff] }
  0x2e   :  { %205 = vmatpush1.msra.mxu1 %v158_v21  ;;  %344 = vmatpush1.msra.mxu0 %v285_v43  ;;  %v268_v60 = vld [vmem:[#allocation5 + $0x38] sm:$0xff]  ;;  %v267_v61 = vld [vmem:[#allocation5 + $0x30] sm:$0xff]  ;;  %v266_v62 = vld [vmem:[#allocation5 + $0x28] sm:$0xff] }
  0x2f   :  { %206 = vmatprep.subr.mxu1 %v157_v22  ;;  %345 = vmatprep.subr.mxu0 %v284_v44  ;;  %v265_v63 = vld [vmem:[#allocation5 + $0x20] sm:$0xff]  ;;  %v264_v0 = vld [vmem:[#allocation5 + $0x18] sm:$0xff]  ;;  %v263_v1 = vld [vmem:[#allocation5 + $0x10] sm:$0xff] }
  0x30   :  { %207 = vmatpush1.msra.mxu1 %v156_v23  ;;  %346 = vmatpush1.msra.mxu0 %v283_v45  ;;  %v262_v2 = vld [vmem:[#allocation5 + $0x8] sm:$0xff]  ;;  %v261_v3 = vld [vmem:[#allocation5] sm:$0xff]  ;;  %v324_v4 = vld [vmem:[#allocation5 + $0x1f8] sm:$0xff] }
  0x31   :  { %208 = vmatprep.subr.mxu1 %v155_v24  ;;  %347 = vmatprep.subr.mxu0 %v282_v46  ;;  %v323_v5 = vld [vmem:[#allocation5 + $0x1f0] sm:$0xff]  ;;  %v322_v6 = vld [vmem:[#allocation5 + $0x1e8] sm:$0xff]  ;;  %v321_v7 = vld [vmem:[#allocation5 + $0x1e0] sm:$0xff] }
  0x32   :  { %209 = vmatpush1.msra.mxu1 %v154_v25  ;;  %348 = vmatpush1.msra.mxu0 %v281_v47  ;;  %v320_v8 = vld [vmem:[#allocation5 + $0x1d8] sm:$0xff]  ;;  %v319_v9 = vld [vmem:[#allocation5 + $0x1d0] sm:$0xff]  ;;  %v318_v10 = vld [vmem:[#allocation5 + $0x1c8] sm:$0xff] }
  0x33   :  { %210 = vmatprep.subr.mxu1 %v153_v26  ;;  %349 = vmatprep.subr.mxu0 %v280_v48  ;;  %v317_v11 = vld [vmem:[#allocation5 + $0x1c0] sm:$0xff]  ;;  %v316_v12 = vld [vmem:[#allocation5 + $0x1b8] sm:$0xff]  ;;  %v315_v13 = vld [vmem:[#allocation5 + $0x1b0] sm:$0xff] }
  0x34   :  { %211 = vmatpush1.msra.mxu1 %v152_v27  ;;  %350 = vmatpush1.msra.mxu0 %v279_v49  ;;  %v314_v14 = vld [vmem:[#allocation5 + $0x1a8] sm:$0xff]  ;;  %v313_v15 = vld [vmem:[#allocation5 + $0x1a0] sm:$0xff]  ;;  %v312_v16 = vld [vmem:[#allocation5 + $0x198] sm:$0xff] }
  0x35   :  { %212 = vmatprep.subr.mxu1 %v151_v28  ;;  %351 = vmatprep.subr.mxu0 %v278_v50  ;;  %v311_v17 = vld [vmem:[#allocation5 + $0x190] sm:$0xff]  ;;  %v310_v18 = vld [vmem:[#allocation5 + $0x188] sm:$0xff]  ;;  %v309_v19 = vld [vmem:[#allocation5 + $0x180] sm:$0xff] }
  0x36   :  { %213 = vmatpush1.msra.mxu1 %v150_v29  ;;  %352 = vmatpush1.msra.mxu0 %v277_v51  ;;  %v308_v20 = vld [vmem:[#allocation5 + $0x178] sm:$0xff]  ;;  %v307_v21 = vld [vmem:[#allocation5 + $0x170] sm:$0xff]  ;;  %v306_v22 = vld [vmem:[#allocation5 + $0x168] sm:$0xff] }
  0x37   :  { %214 = vmatprep.subr.mxu1 %v149_v30  ;;  %353 = vmatprep.subr.mxu0 %v276_v52  ;;  %v305_v23 = vld [vmem:[#allocation5 + $0x160] sm:$0xff]  ;;  %v304_v24 = vld [vmem:[#allocation5 + $0x158] sm:$0xff]  ;;  %v303_v25 = vld [vmem:[#allocation5 + $0x150] sm:$0xff] }
  0x38   :  { %215 = vmatpush1.msra.mxu1 %v148_v31  ;;  %354 = vmatpush1.msra.mxu0 %v275_v53  ;;  %v302_v26 = vld [vmem:[#allocation5 + $0x148] sm:$0xff]  ;;  %v301_v27 = vld [vmem:[#allocation5 + $0x140] sm:$0xff]  ;;  %v537_v28 = vld [vmem:[%s936_s2] ss:$0 sm:$0xff] }
  0x39   :  { %216 = vmatprep.subr.mxu1 %v147_v32  ;;  %355 = vmatprep.subr.mxu0 %v274_v54  ;;  %v297_v36 = vld [vmem:[#allocation5 + $0x120] sm:$0xff]  ;;  %v296_v37 = vld [vmem:[#allocation5 + $0x118] sm:$0xff]  ;;  %v295_v38 = vld [vmem:[#allocation5 + $0x110] sm:$0xff] }
  0x3a   :  { %217 = vmatpush1.msra.mxu1 %v146_v33  ;;  %356 = vmatpush1.msra.mxu0 %v273_v55  ;;  %v300_v33 = vld [vmem:[#allocation5 + $0x138] sm:$0xff]  ;;  %v294_v39 = vld [vmem:[#allocation5 + $0x108] sm:$0xff]  ;;  %v293_v40 = vld [vmem:[#allocation5 + $0x100] sm:$0xff] }
  0x3b   :  { %218 = vmatprep.subr.mxu1 %v145_v34  ;;  %357 = vmatprep.subr.mxu0 %v272_v56  ;;  %v299_v34 = vld [vmem:[#allocation5 + $0x130] sm:$0xff]  ;;  %v440_v43 = vld [vmem:[%s941_s7 + $0xf0] sm:$0xff]  ;;  %v439_v45 = vld [vmem:[%s941_s7 + $0xe8] sm:$0xff] }
  0x3c   :  { %219 = vmatpush1.msra.mxu1 %v144_v35  ;;  %358 = vmatpush1.msra.mxu0 %v271_v57  ;;  %v298_v35 = vld [vmem:[#allocation5 + $0x128] sm:$0xff]  ;;  %v441_v41 = vld [vmem:[%s941_s7 + $0xf8] sm:$0xff]  ;;  %v423_v46 = vld [vmem:[%s941_s7 + $0x68] sm:$0xff] }
  0x3d   :  { %359 = vmatprep.subr.mxu0 %v270_v58  ;;  %v425_v42 = vld [vmem:[%s941_s7 + $0x78] sm:$0xff]  ;;  %543 = vmatprep.subr.mxu1 %v441_v41  ;;  %v424_v44 = vld [vmem:[%s941_s7 + $0x70] sm:$0xff]  ;;  %v438_v47 = vld [vmem:[%s941_s7 + $0xe0] sm:$0xff] }
  0x3e   :  { %360 = vmatpush1.msra.mxu0 %v269_v59  ;;  %v422_v48 = vld [vmem:[%s941_s7 + $0x60] sm:$0xff]  ;;  %v437_v49 = vld [vmem:[%s941_s7 + $0xd8] sm:$0xff]  ;;  %v436_v51 = vld [vmem:[%s941_s7 + $0xd0] sm:$0xff] }
  0x3f   :  { %361 = vmatprep.subr.mxu0 %v268_v60  ;;  %v421_v50 = vld [vmem:[%s941_s7 + $0x58] sm:$0xff]  ;;  %v420_v52 = vld [vmem:[%s941_s7 + $0x50] sm:$0xff]  ;;  %v435_v53 = vld [vmem:[%s941_s7 + $0xc8] sm:$0xff] }
  0x40   :  { %362 = vmatpush1.msra.mxu0 %v267_v61  ;;  %v419_v54 = vld [vmem:[%s941_s7 + $0x48] sm:$0xff]  ;;  %v434_v55 = vld [vmem:[%s941_s7 + $0xc0] sm:$0xff]  ;;  %v433_v57 = vld [vmem:[%s941_s7 + $0xb8] sm:$0xff] }
  0x41   :  { %363 = vmatprep.subr.mxu0 %v266_v62  ;;  %v418_v56 = vld [vmem:[%s941_s7 + $0x40] sm:$0xff]  ;;  %v417_v58 = vld [vmem:[%s941_s7 + $0x38] sm:$0xff]  ;;  %v432_v59 = vld [vmem:[%s941_s7 + $0xb0] sm:$0xff] }
  0x42   :  { %364 = vmatpush1.msra.mxu0 %v265_v63  ;;  %v416_v60 = vld [vmem:[%s941_s7 + $0x30] sm:$0xff]  ;;  %v431_v61 = vld [vmem:[%s941_s7 + $0xa8] sm:$0xff]  ;;  %v430_v63 = vld [vmem:[%s941_s7 + $0xa0] sm:$0xff] }
  0x43   :  { %365 = vmatprep.subr.mxu0 %v264_v0  ;;  %v415_v62 = vld [vmem:[%s941_s7 + $0x28] sm:$0xff]  ;;  %v414_v0 = vld [vmem:[%s941_s7 + $0x20] sm:$0xff] }
  0x44   :  { %366 = vmatpush1.msra.mxu0 %v263_v1  ;;  %v178_v1 = vlaneseq }
  0x45   :  { %367 = vmatprep.subr.mxu0 %v262_v2 }
  0x46   :  { %368 = vmatpush1.msra.mxu0 %v261_v3  ;;  %v179_v2 = vshrl.u32 %v178_v1, 7 }
  0x47   :  { %369 = vmatprep.subr.mxu0 %v324_v4  ;;  %v176_v4 = vld [vmem:[%s938_s4] sm:$0x3] }
  0x48   :  { %370 = vmatpush2.msra.mxu0 %v323_v5  ;;  %v180_v3 = vsub.s32 0, %v179_v2  ;;  %v184_v5 = vsub.s32 1, %v179_v2 }
  0x49   :  { %371 = vmatprep.subr.mxu0 %v322_v6 }
  0x4a   :  { %372 = vmatpush2.msra.mxu0 %v321_v7  ;;  %v181_v6 = vrot.slane %v176_v4, %v180_v3  ;;  %v185_v7 = vrot.slane %v176_v4, %v184_v5 }
  0x4b   :  { %373 = vmatprep.subr.mxu0 %v320_v8 }
  0x4c   :  { %374 = vmatpush2.msra.mxu0 %v319_v9 }
  0x4d   :  { %375 = vmatprep.subr.mxu0 %v318_v10 }
  0x4e   :  { %376 = vmatpush2.msra.mxu0 %v317_v11 }
  0x4f   :  { %377 = vmatprep.subr.mxu0 %v316_v12 }
  0x50   :  { %378 = vmatpush2.msra.mxu0 %v315_v13 }
  0x51   :  { %379 = vmatprep.subr.mxu0 %v314_v14  ;;  %v429_v14 = vld [vmem:[%s941_s7 + $0x98] sm:$0xff] }
  0x52   :  { %380 = vmatpush2.msra.mxu0 %v313_v15  ;;  %v413_v15 = vld [vmem:[%s941_s7 + $0x18] sm:$0xff] }
  0x53   :  { %381 = vmatprep.subr.mxu0 %v312_v16  ;;  %v428_v16 = vld [vmem:[%s941_s7 + $0x90] sm:$0xff] }
  0x54   :  { %382 = vmatpush2.msra.mxu0 %v311_v17  ;;  %v412_v17 = vld [vmem:[%s941_s7 + $0x10] sm:$0xff] }
  0x55   :  { %383 = vmatprep.subr.mxu0 %v310_v18  ;;  %v427_v18 = vld [vmem:[%s941_s7 + $0x88] sm:$0xff] }
  0x56   :  { %384 = vmatpush2.msra.mxu0 %v309_v19  ;;  %v411_v19 = vld [vmem:[%s941_s7 + $0x8] sm:$0xff] }
  0x57   :  { %385 = vmatprep.subr.mxu0 %v308_v20  ;;  %v426_v20 = vld [vmem:[%s941_s7 + $0x80] sm:$0xff] }
  0x58   :  { %386 = vmatpush2.msra.mxu0 %v307_v21  ;;  %v410_v21 = vld [vmem:[%s941_s7] sm:$0xff]  ;;  %s664_s7 = smov [#allocation7]  }
  0x59   :  { %387 = vmatprep.subr.mxu0 %v306_v22  ;;  %v325_v22 = vld [vmem:[%s940_s6] sm:$0x3]  ;;  %s527_s10 = sshll.u32 %s664_s7, 4  ;;  %s528_s10 = int_to_ptr.vmem [resolvable:$true] %s527_s10 }
  0x5a   :  { %388 = vmatpush2.msra.mxu0 %v305_v23  ;;  %v330_v23 = vrot.slane %v325_v22, %v180_v3  ;;  %s632_s6 = scalar_lea.vmem %s528_s10, 128  ;;  %p637_p11 = scmp.lt.s32.totalorder %s528_s10, %s528_s10 }
  0x5b   :  { %389 = vmatprep.subr.mxu0 %v304_v24  ;;  %v334_v24 = vrot.slane %v325_v22, %v184_v5  ;;  %p633_p10 = scmp.ne.s32.totalorder %s528_s10, %s632_s6  ;;  %p638_p12 = scmp.lt.s32.totalorder %s632_s6, %s632_s6 }
  0x5c   :  { %390 = vmatpush2.msra.mxu0 %v303_v25 }
  0x5d   :  { %391 = vmatprep.subr.mxu0 %v302_v26  ;;  %p639_p13 = por %p638_p12, %p637_p11 }
  0x5e   :  { %392 = vmatpush2.msra.mxu0 %v301_v27 }
  0x5f   :  { %393 = vmatprep.subr.mxu0 %v300_v33  ;;  %p640_p0 = pnand %p639_p13, %p633_p10 }
  0x60   :  { %394 = vmatpush2.msra.mxu0 %v299_v34 }
  0x61   :  { %395 = vmatprep.subr.mxu0 %v298_v35 }
  0x62   :  { %396 = vmatpush2.msra.mxu0 %v297_v36 }
  0x63   :  { %397 = vmatprep.subr.mxu0 %v296_v37 }
  0x64   :  { %398 = vmatpush2.msra.mxu0 %v295_v38 }
  0x65   :  { %399 = vmatprep.subr.mxu0 %v294_v39 }
  0x66   :  { %400 = vmatpush2.msra.mxu0 %v293_v40 }
  0xdf   :  { %v139_v29 = vpop.f32.mrf.mxu0 }
  0xe0   :  { %v140_v30 = vadd.f32 %v537_v28, %v139_v29 }
  0xe1   :  { %v584_v31 = vpop.f32.mrf.mxu0 }
  0xe2   :  { %v143_v32 = vmax.f32 %v140_v30, 0.0 }
  0xe4   :  { %253 = vmatmul.mubr.f32.vlgmr.msra.gmra.mxu1 %v143_v32  ;;  %v539_v32 = vld [vmem:[%s942_s8] ss:$0 sm:$0xff] }
  0xe5   :  { %544 = vmatpush3.msra.mxu1 %v425_v42 }
  0xe6   :  { %545 = vmatprep.subr.mxu1 %v440_v43 }
  0xe7   :  { %546 = vmatpush3.msra.mxu1 %v424_v44 }
  0xe8   :  { %547 = vmatprep.subr.mxu1 %v439_v45 }
  0xe9   :  { %548 = vmatpush3.msra.mxu1 %v423_v46 }
  0xea   :  { %549 = vmatprep.subr.mxu1 %v438_v47 }
  0xeb   :  { %550 = vmatpush3.msra.mxu1 %v422_v48 }
  0xec   :  { %551 = vmatprep.subr.mxu1 %v437_v49 }
  0xed   :  { %552 = vmatpush3.msra.mxu1 %v421_v50 }
  0xee   :  { %553 = vmatprep.subr.mxu1 %v436_v51 }
  0xef   :  { %554 = vmatpush3.msra.mxu1 %v420_v52 }
  0xf0   :  { %555 = vmatprep.subr.mxu1 %v435_v53 }
  0xf1   :  { %556 = vmatpush3.msra.mxu1 %v419_v54 }
  0xf2   :  { %557 = vmatprep.subr.mxu1 %v434_v55 }
  0xf3   :  { %558 = vmatpush3.msra.mxu1 %v418_v56 }
  0xf4   :  { %559 = vmatprep.subr.mxu1 %v433_v57 }
  0xf5   :  { %560 = vmatpush3.msra.mxu1 %v417_v58 }
  0xf6   :  { %561 = vmatprep.subr.mxu1 %v432_v59 }
  0xf7   :  { %562 = vmatpush3.msra.mxu1 %v416_v60 }
  0xf8   :  { %563 = vmatprep.subr.mxu1 %v431_v61 }
  0xf9   :  { %564 = vmatpush3.msra.mxu1 %v415_v62 }
  0xfa   :  { %565 = vmatprep.subr.mxu1 %v430_v63 }
  0xfb   :  { %566 = vmatpush3.msra.mxu1 %v414_v0 }
  0xfc   :  { %567 = vmatprep.subr.mxu1 %v429_v14 }
  0xfd   :  { %568 = vmatpush3.msra.mxu1 %v413_v15 }
  0xfe   :  { %569 = vmatprep.subr.mxu1 %v428_v16 }
  0xff   :  { %570 = vmatpush3.msra.mxu1 %v412_v17 }
 0x100   :  { %571 = vmatprep.subr.mxu1 %v427_v18 }
 0x101   :  { %572 = vmatpush3.msra.mxu1 %v411_v19 }
 0x102   :  { %573 = vmatprep.subr.mxu1 %v426_v20 }
 0x103   :  { %574 = vmatpush3.msra.mxu1 %v410_v21 }
 0x1a4   :  { %v254_v8 = vpop.f32.mrf.mxu1 }
 0x1a5   :  { %v255_v9 = vadd.f32 %v254_v8, %v181_v6 }
 0x1a6   :  { %v256_v10 = vpop.f32.mrf.mxu1 }
 0x1a7   :  { %v257_v11 = vadd.f32 %v256_v10, %v185_v7  ;;  %v259_v13 = vmax.f32 %v255_v9, 0.0 }
 0x1a9   :  { %v260_v12 = vmax.f32 %v257_v11, 0.0 }
 0x1ab   :  { %401 = vmatprep.mubr.f32.mxu0 %v260_v12 }
 0x1ac   :  { %402 = vmatmul.mubr.f32.vlgmr.msra.gmra.mxu0 %v259_v13 }
 0x26c   :  { %v403_v25 = vpop.f32.mrf.mxu0 }
 0x26d   :  { %v404_v26 = vadd.f32 %v403_v25, %v330_v23 }
 0x26e   :  { %v405_v27 = vpop.f32.mrf.mxu0 }
 0x26f   :  { %v406_v28 = vadd.f32 %v405_v27, %v334_v24  ;;  %v408_v30 = vmax.f32 %v404_v26, 0.0 }
 0x271   :  { %v409_v29 = vmax.f32 %v406_v28, 0.0 }
 0x273   :  { %513 = vmatprep.mubr.f32.mxu1 %v409_v29 }
 0x274   :  { %514 = vmatmul.mubr.f32.vlgmr.msra.gmra.mxu1 %v408_v30 }
 0x334   :  { %v575_v31 = vpop.f32.mrf.mxu1 }
 0x336   :  { %v576_v33 = vpop.f32.mrf.mxu1 }
 0x337   :  { %v577_v34 = vadd.f32 %v576_v33, %v575_v31 }
 0x339   :  { %v516_v35 = vadd.f32 %v577_v34, %v539_v32 }
 0x33b   :  { %520 = vst.msk [vmem:[#allocation7] sm:$0xff] %vm519_vm2, %v516_v35 }
 0x33c   :  { %643 = shalt.err (!%p640_p0)
}
 0x33d   :  { %530 = dma.vmem_to_hbm [thread:$0]  %s528_s10, 128, %s943_s9, [#allocation4]  }
 0x33e   :  { %656 = dma.done.wait [#allocation4], 128  }
 0x33f   :  { %657 = vsyncadd [#allocation4], 4294967168 }
 0x340   :  { %534 = vsyncpa [#allocation3], 1 }
 0x341   :  { %535 = vsyncpa [#allocation6], 1 }
 0x342   :  { %536 = vsyncpa [#allocation4], 1 }

</bundles_post_ra>
